<compile_context>
chip_gen: v7x
topology: tpu7x:2x2x1
jax: 0.10.0
libtpu: 0.0.40
codegen_flags: <defaults>
</compile_context>

<pallas_src>
import functools

import jax
import jax.numpy as jnp
from jax.experimental import pallas as pl
from jax.experimental.pallas import tpu as pltpu


# ------------------------------ Pallas kernels ------------------------------

def _pool_sum_kernel(x_ref, psum_ref, *, s, num_s):
    """Partial per-(b, c) sums over the flattened-spatial (S) axis.

    Grid = (n_split, B, half_tiles). Axis 0 splits the S-tile range into
    independent halves (so both v7x TensorCores can share the reduction);
    axis 2 is the sequential accumulation axis.

    x_ref:    (1, C, S_TILE) input tile (ragged / duplicated tiles are masked)
    psum_ref: (1, 1, C, 1) f32 partial-sum accumulator, resident across axis 2
    """
    pi = pl.program_id(0)
    si = pl.program_id(2)
    half_tiles = pl.num_programs(2)

    @pl.when(si == 0)
    def _():
        psum_ref[...] = jnp.zeros_like(psum_ref)

    s_tile = x_ref.shape[-1]
    tile_idx = pi * half_tiles + si                      # logical (unclamped) tile id
    start = jnp.minimum(tile_idx, num_s - 1) * s_tile    # matches the index_map clamp

    x = x_ref[...].astype(jnp.float32)                   # (1, C, S_TILE)
    lane = jax.lax.broadcasted_iota(jnp.int32, x.shape, 2)
    valid = jnp.logical_and(start + lane < s, tile_idx < num_s)
    x = jnp.where(valid, x, 0.0)

    psum_ref[0] = psum_ref[0] + jnp.sum(x, axis=-1, keepdims=True)


def _scale_kernel(gate_ref, x_ref, o_ref):
    """Streaming elementwise scale: out = x * gate (gate broadcast over lanes)."""
    o_ref[...] = x_ref[...] * gate_ref[...]


# ------------------------------ host wrapper --------------------------------

def _pick_s_tile(c, s, itemsize, budget_bytes):
    """Largest lane-dense S tile (multiple of 128) with (C, S_TILE) <= budget."""
    lanes = budget_bytes // max(c * itemsize, 1)
    lanes = max(128, (lanes // 128) * 128)
    if s <= lanes:
        return s                    # single full-extent tile (allowed even if not %128)
    return lanes


def eca_layer_3d(x, conv_weight, k_size=3, s_tile=None, tile_budget_bytes=4 << 20):
    """x: (B, C, D, H, W); conv_weight: (k_size,) (PyTorch Conv1d(1,1,k), no bias)."""
    b, c, d, h, w = x.shape
    s = d * h * w
    dtype = x.dtype
    itemsize = jnp.dtype(dtype).itemsize

    x_flat = x.reshape(b, c, s)

    if s_tile is None:
        s_tile = _pick_s_tile(c, s, itemsize, tile_budget_bytes)
    if s_tile != s and s_tile % 128 != 0:
        raise ValueError("s_tile must be a multiple of 128 (or equal to D*H*W)")

    num_s = pl.cdiv(s, s_tile)
    n_split = 2 if num_s >= 2 else 1          # split pass-1 S range across v7x TCs
    half_tiles = pl.cdiv(num_s, n_split)

    # Double-buffered x-in + out tiles (pass 2) plus margin; explicit so the same
    # tile size is legal on v5e (16 MiB scoped default) and fits v7x (64 MiB VMEM).
    tile_bytes = c * s_tile * itemsize
    vmem_limit = int(min(48 << 20, max(4 * tile_bytes + (4 << 20), 24 << 20)))

    # ---- pass 1: partial pooled sums (tiled, masked, 2-way split reduction) ----
    def x_map_pass1(pi, bi, si):
        # Clamp so a logically-out-of-range tile re-reads the last real tile
        # (its contribution is masked to zero inside the kernel).
        return (bi, 0, jnp.minimum(pi * half_tiles + si, num_s - 1))

    partials = pl.pallas_call(
        functools.partial(_pool_sum_kernel, s=s, num_s=num_s),
        out_shape=jax.ShapeDtypeStruct((n_split, b, c, 1), jnp.float32),
        grid=(n_split, b, half_tiles),
        in_specs=[pl.BlockSpec((1, c, s_tile), x_map_pass1)],
        out_specs=pl.BlockSpec((1, 1, c, 1), lambda pi, bi, si: (pi, bi, 0, 0)),
        compiler_params=pltpu.CompilerParams(
            dimension_semantics=("parallel", "parallel", "arbitrary"),
            vmem_limit_bytes=vmem_limit),
        cost_estimate=pl.CostEstimate(
            flops=b * c * s,
            transcendentals=0,
            bytes_accessed=b * c * s * itemsize + n_split * b * c * 4),
    )(x_flat)

    # ---- glue: k-tap 1D conv over channels + sigmoid on the tiny (B, C) vector ----
    mean = jnp.sum(partials, axis=0)[:, :, 0] / float(s)          # (b, c), f32
    pad = (k_size - 1) // 2
    w_taps = conv_weight.reshape(-1).astype(jnp.float32)
    yp = jnp.pad(mean, ((0, 0), (pad, pad)))
    conv = jnp.zeros_like(mean)
    for t in range(k_size):                                       # k is tiny & static
        conv = conv + w_taps[t] * yp[:, t:t + c]
    gate = jax.nn.sigmoid(conv).astype(dtype)[:, :, None]         # (b, c, 1) in x dtype
    # TODO(synk): could fuse this tiny conv+sigmoid into pass 2 under pl.when(si==0)
    # to shave a few XLA dispatches; kept in JAX for lowering robustness.

    # ---- pass 2: streaming mem-bound scale pass (no padding, no output slice) ----
    out_flat = pl.pallas_call(
        _scale_kernel,
        out_shape=jax.ShapeDtypeStruct((b, c, s), dtype),
        grid=(b, num_s),
        in_specs=[
            pl.BlockSpec((1, c, 1), lambda bi, si: (bi, 0, 0)),        # gate (tiny)
            pl.BlockSpec((1, c, s_tile), lambda bi, si: (bi, 0, si)),  # x tile
        ],
        out_specs=pl.BlockSpec((1, c, s_tile), lambda bi, si: (bi, 0, si)),
        compiler_params=pltpu.CompilerParams(
            dimension_semantics=("parallel", "parallel"),
            vmem_limit_bytes=vmem_limit),
        cost_estimate=pl.CostEstimate(
            flops=b * c * s,
            transcendentals=0,
            bytes_accessed=2 * b * c * s * itemsize + b * c * itemsize),
    )(gate, x_flat)

    return out_flat.reshape(b, c, d, h, w)


# ------------------------------ pure-JAX reference --------------------------

def _eca_reference(x, conv_weight, k_size=3):
    b, c, d, h, w = x.shape
    pad = (k_size - 1) // 2
    y = jnp.mean(x.astype(jnp.float32), axis=(2, 3, 4))            # (b, c)
    yp = jnp.pad(y, ((0, 0), (pad, pad)))
    conv = jnp.zeros_like(y)
    for t in range(k_size):
        conv = conv + conv_weight[t] * yp[:, t:t + c]
    gate = jax.nn.sigmoid(conv).astype(x.dtype)[:, :, None, None, None]
    return x * gate


if __name__ == "__main__":
    key = jax.random.PRNGKey(0)
    kx, kw, kx2 = jax.random.split(key, 3)

    K = 3
    conv_weight = jax.random.normal(kw, (K,), dtype=jnp.float32) * 0.5

    # Case 1: tile-aligned S, auto-picked (single-tile) path.
    B, C, D, H, W = 2, 8, 4, 8, 16          # S = 512
    x = jax.random.normal(kx, (B, C, D, H, W), dtype=jnp.float32)
    out = jax.block_until_ready(eca_layer_3d(x, conv_weight, k_size=K))
    ref = _eca_reference(x, conv_weight, k_size=K)
    assert out.shape == x.shape
    assert jnp.allclose(out, ref, atol=1e-5, rtol=1e-5), "mismatch (aligned / auto tile)"

    # Case 2: ragged S (not a multiple of 128) with forced small tiles; exercises the
    # in-kernel mask, the odd tile count, and the 2-way split of the pass-1 reduction.
    B2, C2, D2, H2, W2 = 2, 8, 3, 8, 15     # S = 360 -> 3 tiles of 128 (last ragged)
    x2 = jax.random.normal(kx2, (B2, C2, D2, H2, W2), dtype=jnp.float32)
    out2 = jax.block_until_ready(eca_layer_3d(x2, conv_weight, k_size=K, s_tile=128))
    ref2 = _eca_reference(x2, conv_weight, k_size=K)
    assert jnp.allclose(out2, ref2, atol=1e-5, rtol=1e-5), "mismatch (ragged / tiled)"

    print("KERNEL_OK")
</pallas_src>

<mosaic_0001>
module attributes {stable_mosaic.version = 11 : i64} {
  func.func @_pool_sum_kernel(%arg0: i32, %arg1: i32, %arg2: i32, %arg3: memref<1x8x512xf32, #tpu.memory_space<vmem>>, %arg4: memref<1x1x8x1xf32, #tpu.memory_space<vmem>>) attributes {dimension_semantics = [#tpu.dimension_semantics<parallel>, #tpu.dimension_semantics<parallel>, #tpu.dimension_semantics<arbitrary>], iteration_bounds = array<i64: 1, 2, 1>, scalar_prefetch = 0 : i64, scratch_operands = 0 : i64, tpu.core_type = #tpu.core_type<tc>, window_params = [{transform_indices = @transform_0, window_bounds = array<i64: 1, 8, 512>}, {transform_indices = @transform_1, window_bounds = array<i64: 1, 1, 8, 1>}]} {
    %c0_i32 = arith.constant 0 : i32
    %0 = arith.cmpi eq, %arg2, %c0_i32 : i32
    %1 = arith.extui %0 : i1 to i32
    %c0_i32_0 = arith.constant 0 : i32
    %2 = arith.cmpi ne, %1, %c0_i32_0 : i32
    scf.if %2 {
      %cst_15 = arith.constant 0.000000e+00 : f32
      %26 = vector.broadcast %cst_15 : f32 to vector<1x1x8x1xf32>
      %c0_16 = arith.constant 0 : index
      %c0_17 = arith.constant 0 : index
      %c0_18 = arith.constant 0 : index
      %c0_19 = arith.constant 0 : index
      %27 = vector.load %arg4[%c0_16, %c0_17, %c0_18, %c0_19] : memref<1x1x8x1xf32, #tpu.memory_space<vmem>>, vector<1x1x8x1xf32>
      tpu.vector_store %arg4[%c0_16, %c0_17, %c0_18, %c0_19], %26 {strides = array<i32>} : memref<1x1x8x1xf32, #tpu.memory_space<vmem>>, vector<1x1x8x1xf32>,
    } else {
    }
    %c1_i32 = arith.constant 1 : i32
    %3 = arith.muli %arg0, %c1_i32 : i32
    %4 = arith.addi %3, %arg2 : i32
    %c0_i32_1 = arith.constant 0 : i32
    %5 = arith.minsi %4, %c0_i32_1 : i32
    %c512_i32 = arith.constant 512 : i32
    %6 = arith.muli %5, %c512_i32 : i32
    %c0 = arith.constant 0 : index
    %c0_2 = arith.constant 0 : index
    %c0_3 = arith.constant 0 : index
    %7 = vector.load %arg3[%c0, %c0_2, %c0_3] : memref<1x8x512xf32, #tpu.memory_space<vmem>>, vector<1x8x512xf32>
    %8 = tpu.iota {dimensions = array<i32: 2>} : vector<1x8x512xi32>
    %9 = vector.broadcast %6 : i32 to vector<1x8x512xi32>
    %10 = arith.addi %9, %8 : vector<1x8x512xi32>
    %c512_i32_4 = arith.constant 512 : i32
    %11 = vector.broadcast %c512_i32_4 : i32 to vector<1x8x512xi32>
    %12 = arith.cmpi slt, %10, %11 : vector<1x8x512xi32>
    %c1_i32_5 = arith.constant 1 : i32
    %13 = arith.cmpi slt, %4, %c1_i32_5 : i32
    %14 = vector.broadcast %13 : i1 to vector<1x8x512xi1>
    %15 = arith.andi %12, %14 : vector<1x8x512xi1>
    %cst = arith.constant 0.000000e+00 : f32
    %16 = vector.broadcast %cst : f32 to vector<1x8x512xf32>
    %17 = arith.select %15, %7, %16 : vector<1x8x512xi1>, vector<1x8x512xf32>
    %c0_6 = arith.constant 0 : index
    %c0_7 = arith.constant 0 : index
    %c0_8 = arith.constant 0 : index
    %c0_9 = arith.constant 0 : index
    %18 = vector.load %arg4[%c0_6, %c0_7, %c0_8, %c0_9] : memref<1x1x8x1xf32, #tpu.memory_space<vmem>>, vector<1x1x8x1xf32>
    %19 = vector.shape_cast %18 : vector<1x1x8x1xf32> to vector<1x8x1xf32>
    %cst_10 = arith.constant dense<0.000000e+00> : vector<1x8xf32>
    %20 = vector.multi_reduction <add>, %17, %cst_10 [2] : vector<1x8x512xf32> to vector<1x8xf32>
    %21 = vector.shape_cast %20 : vector<1x8xf32> to vector<1x8x1xf32>
    %22 = arith.addf %19, %21 : vector<1x8x1xf32>
    %c0_11 = arith.constant 0 : index
    %c0_12 = arith.constant 0 : index
    %c0_13 = arith.constant 0 : index
    %c0_14 = arith.constant 0 : index
    %23 = vector.load %arg4[%c0_11, %c0_12, %c0_13, %c0_14] : memref<1x1x8x1xf32, #tpu.memory_space<vmem>>, vector<1x1x8x1xf32>
    %24 = vector.shape_cast %23 : vector<1x1x8x1xf32> to vector<1x8x1xf32>
    %25 = vector.shape_cast %22 : vector<1x8x1xf32> to vector<1x1x8x1xf32>
    tpu.vector_store %arg4[%c0_11, %c0_12, %c0_13, %c0_14], %25 {strides = array<i32>} : memref<1x1x8x1xf32, #tpu.memory_space<vmem>>, vector<1x1x8x1xf32>,
    return
  }
  func.func @transform_0(%arg0: i32, %arg1: i32, %arg2: i32) -> (i32, i32, i32) {
    %c1_i32 = arith.constant 1 : i32
    %0 = arith.muli %arg0, %c1_i32 : i32
    %1 = arith.addi %0, %arg2 : i32
    %c0_i32 = arith.constant 0 : i32
    %2 = arith.minsi %1, %c0_i32 : i32
    %c0_i32_0 = arith.constant 0 : i32
    %c0_i32_1 = arith.constant 0 : i32
    return %arg1, %c0_i32_0, %2 : i32, i32, i32
  }
  func.func @transform_1(%arg0: i32, %arg1: i32, %arg2: i32) -> (i32, i32, i32, i32) {
    %c0_i32 = arith.constant 0 : i32
    %c0_i32_0 = arith.constant 0 : i32
    %c0_i32_1 = arith.constant 0 : i32
    return %arg0, %arg1, %c0_i32, %c0_i32_0 : i32, i32, i32, i32
  }
}

</mosaic_0001>

<bundles_post_ra>
// kernel: tpu_custom_call.1
= control target key start
LH: loop header
LB: loop body
LE: loop exit
PB: predicated region body
PF: predicated region fallthrough
CT: control target
= control target key end

     0   :  { %6 = vsyncpa [#allocation3], 0  ;;  %s613_s0 = inlined_call_operand.hbm [shape: f32[2,8,512], index: 0, kind: input, shape index: {}]   ;;  %s614_s1 = inlined_call_operand.vmem [shape: f32[1,2,8,1], index: 1, kind: output, shape index: {}]  }
   0x1   :  { %8 = vsyncpa [#allocation3 + $0x1], 0  ;;  %s486_s6 = smov 0   ;;  %s488_s7 = smov 0  }
   0x2   :  { %s490_s8 = smov 0   ;;  %s492_s9 = smov 0  }
   0x3   :  { %s494_s10 = smov 0   ;;  %s496_s11 = smov 0  }
   0x4 LB: > { %s323_s12 = sadd.s32 4294967295, %s472_s11   ;;  %s29_s13 = sadd.s32 1, %s468_s10  ;;  %s472_s11 = sphi %s496_s11, %s14_s11   ;;  %s468_s10 = sphi %s494_s10, %s624_s10   ;;  %s464_s9 = sphi %s492_s9, %s623_s9   ;;  %s460_s8 = sphi %s490_s8, %s622_s8   ;;  %s456_s7 = sphi %s488_s7, %s621_s7   ;;  %s452_s6 = sphi %s486_s6, %s620_s6  }
   0x5   : > { %p31_p0 = scmp.ge.s32.totalorder %s29_s13, 2  ;;  %s48_s14 = sadd.s32 1, %s460_s8 }
   0x6   : > { %p55_p1 = scmp.ne.s32.totalorder %s460_s8, %s456_s7  ;;  %p56_p2 = scmp.eq.s32.totalorder %s472_s11, 0 }
   0x7   : > { %s626_s13 = smov (%p31_p0, %s29_s13), 0  ;;  %p61_p4 = scmp.ne.s32.totalorder %s456_s7, %s452_s6 }
   0x8   : > { %p522_p3 = por %p56_p2, %p55_p1  ;;  %s43_s16 = ssub.s32 %s468_s10, %s626_s13 }
   0x9   : > { %p62_p5 = scmp.eq.s32.totalorder %s323_s12, 0  ;;  %p46_p6 = scmp.eq.s32.totalorder %s43_s16, 0 }
   0xa   : > { %p342_p8 = scmp.lt.s32.totalorder %s472_s11, 2  ;;  %s113_s19 = sand.u32 1, %s460_s8  }
   0xb   : > { %p529_p7 = por %p62_p5, %p61_p4  ;;  %s335_s20 = sshll.u32 %s468_s10, 9 }
   0xc   : > { %s535_s18 = scalar_select %p46_p6, %s460_s8, %s48_s14  }
   0xd   : > { %s327_s21 = sshll.u32 %s113_s19, 5  ;;  %s542_s24 = scalar_lea.hbm %s613_s0, %s335_s20 }
   0xe   : > { %s117_s25 = scalar_lea.vmem [#allocation2], %s327_s21  ;;  %p546_p9 = pnand %p342_p8, %p522_p3 }
   0xf   : > { %s130_s26 = sshll.u32 %s117_s25, 4  ;;  %s114_s28 = scalar_lea.sflag [#allocation3], %s113_s19  ;;  %s550_s26 = int_to_ptr.vmem [resolvable:$true] %s130_s26 }
  0x10   : > { %s392_s29 = scalar_lea.hbm %s542_s24, 512  ;;  %p394_p13 = pneg %p546_p9 }
  0x11   : > { %p393_p12 = scmp.ne.s32.totalorder %s542_s24, %s392_s29  ;;  %s397_s3 = scalar_lea.hbm %s613_s0, 1024 }
  0x12   : > { %p398_p2 = scmp.lt.u32.totalorder %s542_s24, %s613_s0  ;;  %p399_p3 = scmp.lt.u32.totalorder %s397_s3, %s392_s29 }
  0x13   : > { %p395_p0 = pnand %p394_p13, %p393_p12  ;;  %p401_p5 = scmp.lt.u32.totalorder %s392_s29, %s542_s24 }
  0x14   : > { %p400_p4 = por %p399_p3, %p398_p2 }
  0x15   : > { %p396_p1 = pneg %p395_p0 }
  0x16   : > { %p402_p6 = por %p401_p5, %p400_p4 }
  0x18   : > { %p403_p8 = pnand %p402_p6, %p396_p1 }
  0x1a   : > { %406 = shalt.err (!%p403_p8)
}
  0x1b   : > { %s407_s6 = scalar_lea.vmem %s550_s26, 512  ;;  %s474_s12 = smov [#allocation2]  }
  0x1c   : > { %p408_p12 = scmp.ne.s32.totalorder %s550_s26, %s407_s6  ;;  %s412_s14 = sshll.u32 %s474_s12, 4  ;;  %s413_s14 = int_to_ptr.vmem [resolvable:$false] %s412_s14 }
  0x1d   : > { %s414_s15 = scalar_lea.vmem %s413_s14, 1024  ;;  %p415_p11 = scmp.lt.s32.totalorder %s550_s26, %s413_s14 }
  0x1e   : > { %p410_p0 = pnand %p408_p12, %p394_p13  ;;  %p416_p2 = scmp.lt.s32.totalorder %s414_s15, %s407_s6 }
  0x20   : > { %p411_p10 = pneg %p410_p0  ;;  %p417_p3 = por %p416_p2, %p415_p11 }
  0x22   : > { %p418_p4 = pnand %p417_p3, %p411_p10 }
  0x24   : > { %421 = shalt.err (!%p418_p4)
}
  0x25   : > { %341 = dma.hbm_to_vmem [thread:$0]  (!%p546_p9), %s542_s24, 512, %s550_s26, %s114_s28  }
  0x26   : > { %p618_p1 = scmp.lt.s32.totalorder %s472_s11, 3  ;;  %p619_p5 = scmp.ge.s32.totalorder %s472_s11, 1 }
  0x28   : > { %p136_p13 = pnand %p619_p5, %p618_p1 }
  0x29   : > { %s141_s16 = sand.u32 (!%p136_p13), 1, %s456_s7  }
  0x2a   : > { %139 = sbr.rel (%p136_p13) target bundleno = 202 (0xca), region = 24  ;;  %s331_s19 = sshll.u32 (!%p136_p13), %s141_s16, 5 }
  0x2b   : > { %s142_s20 = scalar_lea.sflag (!%p136_p13), [#allocation3], %s141_s16  ;;  %s145_s21 = scalar_lea.vmem (!%p136_p13), [#allocation2], %s331_s19 }
  0x31   : > { %447 = dma.done.wait (%p529_p7), %s142_s20, 512  }
  0x32   : > { %449 = vsyncadd (%p529_p7), %s142_s20, 4294966784  ;;  %p173_p10 = scmp.lt.s32.totalorder %s464_s9, 1  ;;  %vm183_vm0 = vcmask 7168   ;;  %v475_v0 = vmov 0.0   ;;  %v189_v1 = vld [vmem:[%s145_s21] sm:$0xff]  ;;  %v190_v2 = vld [vmem:[%s145_s21 + $0x8] sm:$0xff] }
  0x33   : > { %v191_v3 = vld [vmem:[%s145_s21 + $0x10] sm:$0xff]  ;;  %v220_v4 = vadd.f32 %v190_v2, %v189_v1  ;;  %v192_v5 = vld [vmem:[%s145_s21 + $0x18] sm:$0xff] }
  0x34   : > { %s628_s9 = smov (!%p173_p10, %s464_s9), 1 }
  0x35   : > { %s332_s22 = sshll.u32 %s628_s9, 3  ;;  %v221_v6 = vadd.f32 %v220_v4, %v191_v3 }
  0x36   : > { %s178_s25 = scalar_lea.vmem %s614_s1, %s332_s22 }
  0x37   : > { %184 = vst.msk [vmem:[%s178_s25] sm:$0xff] %vm183_vm0, %v475_v0  ;;  %v222_v7 = vadd.f32 %v221_v6, %v192_v5 }
  0x39   : > { %223 = vadd.xlane.f32.xlu0 %v222_v7 }
  0x3e   : > { %v219_v8 = vld [vmem:[%s178_s25] sm:$0xff] }
  0xc6   : > { %v224_v9 = vpop.xlane.xlu0 %223 }
  0xc7   : > { %v225_v10 = vadd.f32 %v224_v9, %v219_v8 }
  0xc9   : > { %227 = vst.msk [vmem:[%s178_s25] sm:$0xff] %vm183_vm0, %v225_v10 }
  0xca PF: > { %s14_s11 = sadd.s32 1, %s472_s11   ;;  %s620_s6 = smov %s456_s7 }
  0xcb   : > { %p11_p7 = scmp.ge.s32.totalorder %s14_s11, 4   ;;  %s621_s7 = smov %s460_s8 }
  0xcc   : > { %s622_s8 = smov %s535_s18  ;;  %s623_s9 = smov %s468_s10 }
  0xcd   : > { %s624_s10 = smov %s626_s13  ;;  %13 = sbr.rel (!%p11_p7) target bundleno = 4 (0x4), region = 68 }
  0xd4   :  { %255 = vsyncpa [#allocation3], 1 }
  0xd5   :  { %257 = vsyncpa [#allocation3 + $0x1], 1 }

</bundles_post_ra>
